<compile_context>
chip_gen: v7x
topology: tpu7x:2x2x1
jax: 0.10.0
libtpu: 0.0.40
codegen_flags: <defaults>
</compile_context>

<pallas_src>
import math

import jax
import jax.numpy as jnp
from jax.experimental import pallas as pl
from jax.experimental.pallas import tpu as pltpu


_LANES = 128
_VMEM_LIMIT_BYTES = 32 * 1024 * 1024        # scoped VMEM request, safe on v5e/v6e/v7x
_INPUT_VMEM_BUDGET = 24 * 1024 * 1024       # budget for the double-buffered input tile


# ----------------------------- kernels ------------------------------------- #

def _sqrt_sum_packed_kernel(s_ref, x_ref, o_ref):
    # x_ref: (TR, 128) lane-dense tile; each row holds G = 128 // o original rows.
    # s_ref: (128, G) constant 0/1 selection matrix, s[k, g] = (k // o == g).
    # o_ref: (TR, G) objective values, one per original row.
    y = jnp.sqrt(x_ref[...].astype(jnp.float32))
    o_ref[...] = jnp.dot(
        y, s_ref[...], preferred_element_type=jnp.float32
    ).astype(o_ref.dtype)


def _sqrt_sum_rowwise_kernel(x_ref, o_ref):
    # Fallback path (o does not divide 128, or R not a multiple of 128 // o).
    # x_ref: (TR, o); o_ref: (TR, 1).
    y = jnp.sqrt(x_ref[...].astype(jnp.float32))
    o_ref[...] = jnp.sum(y, axis=-1, keepdims=True).astype(o_ref.dtype)


# ----------------------------- wrappers ------------------------------------ #

def _pick_tile_rows(rows, row_bytes, max_tile_rows):
    """Largest row tile that fits the double-buffered input VMEM budget."""
    cap = max(8, _INPUT_VMEM_BUDGET // (2 * row_bytes))
    tr = min(max_tile_rows, cap)
    if rows <= tr:
        return rows                      # single block; equals the full dim
    return max(8, (tr // 8) * 8)         # sublane-aligned tile; cdiv grid (ragged ok)


def _sqrt_sum_packed(flat, o, *, max_tile_rows):
    """sqrt(x).sum(-1) for [R, o] when o divides 128 and R % (128 // o) == 0."""
    r = flat.shape[0]
    g = _LANES // o
    rows = r // g
    packed = flat.reshape(rows, _LANES)              # free, contiguous view
    itemsize = jnp.dtype(flat.dtype).itemsize
    tr = _pick_tile_rows(rows, _LANES * itemsize, max_tile_rows)
    grid = (pl.cdiv(rows, tr),)

    # 0/1 selection matrix implementing the grouped lane reduction on the MXU.
    sel = (
        jnp.arange(_LANES, dtype=jnp.int32)[:, None] // o
        == jnp.arange(g, dtype=jnp.int32)[None, :]
    ).astype(jnp.float32)

    out = pl.pallas_call(
        _sqrt_sum_packed_kernel,
        out_shape=jax.ShapeDtypeStruct((rows, g), flat.dtype),
        grid_spec=pltpu.PrefetchScalarGridSpec(
            num_scalar_prefetch=0,
            grid=grid,
            in_specs=[
                pl.BlockSpec((_LANES, g), lambda i: (0, 0)),       # constant sel
                pl.BlockSpec((tr, _LANES), lambda i: (i, 0)),      # lane-dense rows
            ],
            out_specs=pl.BlockSpec((tr, g), lambda i: (i, 0)),
        ),
        compiler_params=pltpu.CompilerParams(
            dimension_semantics=("parallel",),
            vmem_limit_bytes=_VMEM_LIMIT_BYTES,
        ),
    )(sel, packed)
    return out.reshape(r)


def _sqrt_sum_rowwise(flat, *, max_tile_rows):
    """General fallback: sqrt(x).sum(-1) for an arbitrary [R, o] slab."""
    r, o = flat.shape
    itemsize = jnp.dtype(flat.dtype).itemsize
    o_padded = ((o + _LANES - 1) // _LANES) * _LANES     # lane padding in VMEM
    tr = _pick_tile_rows(r, o_padded * itemsize, max_tile_rows)
    grid = (pl.cdiv(r, tr),)

    out = pl.pallas_call(
        _sqrt_sum_rowwise_kernel,
        out_shape=jax.ShapeDtypeStruct((r, 1), flat.dtype),
        grid_spec=pltpu.PrefetchScalarGridSpec(
            num_scalar_prefetch=0,
            grid=grid,
            in_specs=[pl.BlockSpec((tr, o), lambda i: (i, 0))],
            out_specs=pl.BlockSpec((tr, 1), lambda i: (i, 0)),
        ),
        compiler_params=pltpu.CompilerParams(
            dimension_semantics=("parallel",),
            vmem_limit_bytes=_VMEM_LIMIT_BYTES,
        ),
    )(flat)
    return out[:, 0]


def pallas_sqrt_sum_objective(samples, *, max_tile_rows=8192):
    """objective(Y) = sqrt(Y).sum(dim=-1), with sqrt + reduce computed in Pallas."""
    lead_shape = samples.shape[:-1]          # sample_shape x batch_shape x q
    o = samples.shape[-1]                    # number of outcomes
    r = math.prod(lead_shape) if lead_shape else 1
    flat = samples.reshape(r, o)

    packable = (o <= _LANES) and (_LANES % o == 0) and (_LANES // o > 1)
    if packable and r % (_LANES // o) == 0:
        out_flat = _sqrt_sum_packed(flat, o, max_tile_rows=max_tile_rows)
    else:
        out_flat = _sqrt_sum_rowwise(flat, max_tile_rows=max_tile_rows)
    return out_flat.reshape(lead_shape)


# ----------------------------- module port --------------------------------- #

class GenericMCObjective:
    """JAX/Pallas port of botorch's GenericMCObjective.

    `objective` maps a `sample_shape x batch_shape x q x o` array to a
    `sample_shape x batch_shape x q` array; forward() just applies it.
    """

    # TODO(synk): an arbitrary user-supplied Python callable cannot be turned into
    # a single fixed Pallas kernel; we fuse the canonical sqrt-sum example here.

    def __init__(self, objective):
        self.objective = objective

    def __call__(self, samples):
        return self.forward(samples)

    def forward(self, samples):
        return self.objective(samples)


# ----------------------------- demo / check --------------------------------- #

if __name__ == "__main__":
    key = jax.random.PRNGKey(0)
    mc_obj = GenericMCObjective(pallas_sqrt_sum_objective)

    # 1) canonical case: sample_shape=4, batch=2, q=8, o=32 -> lane-packed MXU path.
    k1, k2, k3 = jax.random.split(key, 3)
    samples = jnp.abs(jax.random.normal(k1, (4, 2, 8, 32), dtype=jnp.float32))
    out = jax.block_until_ready(mc_obj(samples))
    ref = jnp.sqrt(samples).sum(axis=-1)
    assert out.shape == (4, 2, 8), out.shape
    assert jnp.allclose(out, ref, atol=1e-4, rtol=1e-4)

    # 2) fallback path: o=48 does not divide 128 -> rowwise kernel.
    samples2 = jnp.abs(jax.random.normal(k2, (3, 5, 48), dtype=jnp.float32))
    out2 = jax.block_until_ready(mc_obj(samples2))
    ref2 = jnp.sqrt(samples2).sum(axis=-1)
    assert out2.shape == (3, 5), out2.shape
    assert jnp.allclose(out2, ref2, atol=1e-4, rtol=1e-4)

    # 3) ragged grid: rows not divisible by the tile -> cdiv + masked last block.
    samples3 = jnp.abs(jax.random.normal(k3, (2, 100, 32), dtype=jnp.float32))
    out3 = jax.block_until_ready(
        pallas_sqrt_sum_objective(samples3, max_tile_rows=8)
    )
    ref3 = jnp.sqrt(samples3).sum(axis=-1)
    assert out3.shape == (2, 100), out3.shape
    assert jnp.allclose(out3, ref3, atol=1e-4, rtol=1e-4)

    # 4) bf16 input path (upcast to f32 inside the kernel, output back in bf16).
    samples4 = jnp.abs(jax.random.normal(key, (2, 4, 64), dtype=jnp.float32))
    out4 = jax.block_until_ready(mc_obj(samples4.astype(jnp.bfloat16)))
    ref4 = jnp.sqrt(samples4.astype(jnp.bfloat16).astype(jnp.float32)).sum(axis=-1)
    assert out4.shape == (2, 4), out4.shape
    assert jnp.allclose(out4.astype(jnp.float32), ref4, atol=5e-1, rtol=5e-2)

    print("KERNEL_OK")
</pallas_src>

<mosaic_0001>
module attributes {stable_mosaic.version = 11 : i64} {
  func.func @_sqrt_sum_packed_kernel(%arg0: i32, %arg1: memref<128x4xf32, #tpu.memory_space<vmem>>, %arg2: memref<16x128xf32, #tpu.memory_space<vmem>>, %arg3: memref<16x4xf32, #tpu.memory_space<vmem>>) attributes {dimension_semantics = [#tpu.dimension_semantics<parallel>], iteration_bounds = array<i64: 1>, scalar_prefetch = 0 : i64, scratch_operands = 0 : i64, tpu.core_type = #tpu.core_type<tc>, window_params = [{pipeline_mode = #tpu.pipeline_mode<synchronous>, transform_indices = @transform_0, window_bounds = array<i64: 128, 4>}, {transform_indices = @transform_1, window_bounds = array<i64: 16, 128>}, {transform_indices = @transform_2, window_bounds = array<i64: 16, 4>}]} {
    %c0 = arith.constant 0 : index
    %c0_0 = arith.constant 0 : index
    %0 = vector.load %arg2[%c0, %c0_0] : memref<16x128xf32, #tpu.memory_space<vmem>>, vector<16x128xf32>
    %1 = math.sqrt %0 : vector<16x128xf32>
    %c0_1 = arith.constant 0 : index
    %c0_2 = arith.constant 0 : index
    %2 = vector.load %arg1[%c0_1, %c0_2] : memref<128x4xf32, #tpu.memory_space<vmem>>, vector<128x4xf32>
    %cst = arith.constant dense<0.000000e+00> : vector<16x4xf32>
    %3 = tpu.matmul %1, %2, %cst {dimension_numbers = #tpu.dot_dimension_numbers<[1], [0], [0], [1], [0, 0, 1, 1], [], []>} : vector<16x128xf32>, vector<128x4xf32>, vector<16x4xf32> -> vector<16x4xf32>
    %c0_3 = arith.constant 0 : index
    %c0_4 = arith.constant 0 : index
    %4 = vector.load %arg3[%c0_3, %c0_4] : memref<16x4xf32, #tpu.memory_space<vmem>>, vector<16x4xf32>
    tpu.vector_store %arg3[%c0_3, %c0_4], %3 {strides = array<i32>} : memref<16x4xf32, #tpu.memory_space<vmem>>, vector<16x4xf32>,
    return
  }
  func.func @transform_0(%arg0: i32) -> (i32, i32) {
    %c0_i32 = arith.constant 0 : i32
    %c0_i32_0 = arith.constant 0 : i32
    %c0_i32_1 = arith.constant 0 : i32
    return %c0_i32, %c0_i32_0 : i32, i32
  }
  func.func @transform_1(%arg0: i32) -> (i32, i32) {
    %c0_i32 = arith.constant 0 : i32
    %c0_i32_0 = arith.constant 0 : i32
    return %arg0, %c0_i32 : i32, i32
  }
  func.func @transform_2(%arg0: i32) -> (i32, i32) {
    %c0_i32 = arith.constant 0 : i32
    %c0_i32_0 = arith.constant 0 : i32
    return %arg0, %c0_i32 : i32, i32
  }
}

</mosaic_0001>

<bundles_post_ra>
// kernel: tpu_custom_call.1
= control target key start
LH: loop header
LB: loop body
LE: loop exit
PB: predicated region body
PF: predicated region fallthrough
CT: control target
= control target key end

     0   :  { %vm118_vm4 = vcmask 31744   ;;  %s289_s0 = inlined_call_operand.vmem [shape: f32[128,4], index: 0, kind: input, shape index: {}]   ;;  %s290_s1 = inlined_call_operand.vmem [shape: f32[16,128], index: 1, kind: input, shape index: {}]   ;;  %s291_s2 = inlined_call_operand.vmem [shape: f32[16,4], index: 2, kind: output, shape index: {}]  }
   0x1   :  { %v27_v0 = vld [vmem:[%s289_s0] sm:$0xff]  ;;  %v28_v1 = vld [vmem:[%s289_s0 + $0x8] sm:$0xff]  ;;  %v29_v2 = vld [vmem:[%s289_s0 + $0x10] sm:$0xff] }
   0x2   :  { %v178_v3 = vpack.c.bf16 %v28_v1, %v27_v0  ;;  %v30_v4 = vld [vmem:[%s289_s0 + $0x18] sm:$0xff]  ;;  %v31_v6 = vld [vmem:[%s289_s0 + $0x20] sm:$0xff]  ;;  %v32_v7 = vld [vmem:[%s289_s0 + $0x28] sm:$0xff] }
   0x3   :  { %v182_v5 = vpack.c.bf16 %v30_v4, %v29_v2  ;;  %v186_v8 = vpack.c.bf16 %v32_v7, %v31_v6  ;;  %v11_v9 = vld [vmem:[%s290_s1] sm:$0xff]  ;;  %v33_v10 = vld [vmem:[%s289_s0 + $0x30] sm:$0xff]  ;;  %v34_v11 = vld [vmem:[%s289_s0 + $0x38] sm:$0xff] }
   0x4   :  { %179 = vmatprep.subr.bf16.mxu0 %v178_v3  ;;  %210 = vrsqrt.f32 %v11_v9  ;;  %v190_v12 = vpack.c.bf16 %v34_v11, %v33_v10  ;;  %v12_v13 = vld [vmem:[%s290_s1 + $0x8] sm:$0xff]  ;;  %v35_v14 = vld [vmem:[%s289_s0 + $0x40] sm:$0xff]  ;;  %v37_v17 = vld [vmem:[%s289_s0 + $0x50] sm:$0xff]  ;;  %vm15_vm0 = vcmp.eq.f32.partialorder %v11_v9, inf  ;;  %v18_v20 = vand.u32 2147483648, %v11_v9 }
   0x5   :  { %181 = vmatpush3.bf16.msra.mxu0 %v178_v3  ;;  %v36_v15 = vld [vmem:[%s289_s0 + $0x48] sm:$0xff]  ;;  %212 = vrsqrt.f32 %v12_v13  ;;  %v38_v18 = vld [vmem:[%s289_s0 + $0x58] sm:$0xff]  ;;  %vm17_vm1 = vcmp.eq.f32.partialorder %v11_v9, 0.0  ;;  %v39_v23 = vld [vmem:[%s289_s0 + $0x60] sm:$0xff]  ;;  %vm22_vm2 = vcmp.eq.f32.partialorder %v12_v13, inf  ;;  %v25_v33 = vand.u32 2147483648, %v12_v13 }
   0x6   :  { %183 = vmatprep.subr.bf16.mxu0 %v182_v5  ;;  %v194_v16 = vpack.c.bf16 %v36_v15, %v35_v14  ;;  %v198_v21 = vpack.c.bf16 %v38_v18, %v37_v17  ;;  %v40_v24 = vld [vmem:[%s289_s0 + $0x68] sm:$0xff]  ;;  %v41_v29 = vld [vmem:[%s289_s0 + $0x70] sm:$0xff]  ;;  %v42_v30 = vld [vmem:[%s289_s0 + $0x78] sm:$0xff]  ;;  %vm24_vm3 = vcmp.eq.f32.partialorder %v12_v13, 0.0 }
   0x7   :  { %v202_v27 = vpack.c.bf16 %v40_v24, %v39_v23  ;;  %v206_v31 = vpack.c.bf16 %v42_v30, %v41_v29 }
   0x9   :  { %185 = vmatpush3.bf16.msra.mxu0 %v182_v5 }
   0xa   :  { %187 = vmatprep.subr.bf16.mxu0 %v186_v8 }
   0xd   :  { %189 = vmatpush3.bf16.msra.mxu0 %v186_v8 }
   0xe   :  { %191 = vmatprep.subr.bf16.mxu0 %v190_v12  ;;  %v211_v19 = vpop.eup %210 }
   0xf   :  { %v14_v22 = vmul.f32 %v211_v19, %v11_v9  ;;  %v213_v28 = vpop.eup %212 }
  0x10   :  { %v21_v32 = vmul.f32 %v213_v28, %v12_v13 }
  0x11   :  { %193 = vmatpush3.bf16.msra.mxu0 %v190_v12  ;;  %v16_v25 = vsel %vm15_vm0, %v11_v9, %v14_v22 }
  0x12   :  { %195 = vmatprep.subr.bf16.mxu0 %v194_v16  ;;  %v19_v26 = vsel %vm17_vm1, %v18_v20, %v16_v25  ;;  %v23_v34 = vsel %vm22_vm2, %v12_v13, %v21_v32 }
  0x13   :  { %175 = vmatprep.mubr.f32.mxu0 %v19_v26  ;;  %v26_v35 = vsel %vm24_vm3, %v25_v33, %v23_v34 }
  0x15   :  { %197 = vmatpush3.bf16.msra.mxu0 %v194_v16 }
  0x16   :  { %199 = vmatprep.subr.bf16.mxu0 %v198_v21 }
  0x19   :  { %201 = vmatpush3.bf16.msra.mxu0 %v198_v21 }
  0x1a   :  { %203 = vmatprep.subr.bf16.mxu0 %v202_v27 }
  0x1d   :  { %205 = vmatpush3.bf16.msra.mxu0 %v202_v27 }
  0x1e   :  { %207 = vmatprep.subr.bf16.mxu0 %v206_v31 }
  0x21   :  { %209 = vmatpush3.bf16.msra.mxu0 %v206_v31 }
  0x24   :  { %176 = vmatmul.mubr.f32.vlgmr.msra.gmra.mrb[0].mxu0 %v26_v35 }
  0xf7   :  { %v177_v36 = vpop.f32.mrb[0].mxu0 }
  0xf8   :  { %120 = vst.msk [vmem:[%s291_s2 + $0x8] sm:$0xff] %vm118_vm4, %v177_v36  ;;  %v109_v37 = vpop.f32.mrb[1].mxu0 }
  0xf9   :  { %119 = vst.msk [vmem:[%s291_s2] sm:$0xff] %vm118_vm4, %v109_v37 }

</bundles_post_ra>
